<compile_context>
chip_gen: v5e
topology: v5e:2x2
jax: 0.10.0
libtpu: 0.0.40
codegen_flags: <defaults>
</compile_context>

<pallas_src>
import functools
import math

import jax
import jax.numpy as jnp
from jax.experimental import pallas as pl
from jax.experimental.pallas import tpu as pltpu

# Plain Python float: a module-level jnp scalar would be captured as a kernel
# constant ("captures constants [f32[]]") and abort tracing.
_NEG_INF = -1e30


# ---------------------------------------------------------------------------
# Kernel 1: AdaLN residual + fused QKV projection (lane-dense (ts, D) outputs)
# ---------------------------------------------------------------------------
def _qkv_proj_kernel(x_ref, wqkv_ref, bqkv_ref, q_ref, k_ref, v_ref, *,
                     dim, q_scale, adaLN_C, adaLN_eps):
    x = x_ref[...].astype(jnp.float32)                        # (TS, D)
    rms = jnp.sqrt(jnp.mean(x * x, axis=-1, keepdims=True))
    y = x + adaLN_C * x / (rms + adaLN_eps)                   # f32 elementwise

    # One MXU pass over the fused (D, 3D) weight, f32 accumulate.
    qkv = jnp.dot(y.astype(jnp.bfloat16), wqkv_ref[...],
                  preferred_element_type=jnp.float32) + bqkv_ref[...]

    # Lane-dense stores (last dim = D). 1/sqrt(dh) folded into q here, once,
    # instead of multiplying every (tq, tk) score tile in the attention loop.
    q_ref[...] = (qkv[:, 0 * dim:1 * dim] * q_scale).astype(q_ref.dtype)
    k_ref[...] = qkv[:, 1 * dim:2 * dim].astype(k_ref.dtype)
    v_ref[...] = qkv[:, 2 * dim:3 * dim].astype(v_ref.dtype)


# ---------------------------------------------------------------------------
# Kernel 2: flash-style causal attention + output projection
#   q/k/v tiles are (tile, D) lane-dense; heads are split with static lane
#   slices (no head-major relayouts).  Online softmax state is per head:
#   m, l: (tq, H) f32    acc: (tq, D) f32 (head h occupies columns h*dh:(h+1)*dh)
# ---------------------------------------------------------------------------
def _flash_attn_out_kernel(q_ref, k_ref, v_ref, wo_ref, bo_ref, o_ref,
                           m_sc, l_sc, acc_sc, *, nheads, dh, tq, tk):
    qi = pl.program_id(1)
    ki = pl.program_id(2)

    @pl.when(ki == 0)
    def _init():
        m_sc[...] = jnp.full_like(m_sc, _NEG_INF)
        l_sc[...] = jnp.zeros_like(l_sc)
        acc_sc[...] = jnp.zeros_like(acc_sc)

    q_start = qi * tq
    k_start = ki * tk
    contributes = k_start <= q_start + (tq - 1)     # tile not fully above diagonal
    needs_mask = k_start + (tk - 1) > q_start       # tile crosses the diagonal

    def accumulate(apply_mask):
        q = q_ref[...]                              # (TQ, D) bf16, pre-scaled
        k = k_ref[...]                              # (TK, D) bf16
        v = v_ref[...]                              # (TK, D) bf16
        if apply_mask:
            row = q_start + jax.lax.broadcasted_iota(jnp.int32, (tq, tk), 0)
            col = k_start + jax.lax.broadcasted_iota(jnp.int32, (tq, tk), 1)
            mask = col <= row
        for h in range(nheads):                     # static per-head lane slices
            hs = slice(h * dh, (h + 1) * dh)
            s = jnp.einsum('qd,kd->qk', q[:, hs], k[:, hs],
                           preferred_element_type=jnp.float32)       # (TQ, TK)
            if apply_mask:
                s = jnp.where(mask, s, _NEG_INF)
            m_prev = m_sc[:, h:h + 1]                                  # (TQ, 1)
            m_new = jnp.maximum(m_prev, jnp.max(s, axis=-1, keepdims=True))
            alpha = jnp.exp(m_prev - m_new)
            p = jnp.exp(s - m_new)                                     # (TQ, TK)
            if apply_mask:
                p = jnp.where(mask, p, 0.0)   # guard fully-masked rows
            l_sc[:, h:h + 1] = alpha * l_sc[:, h:h + 1] + jnp.sum(
                p, axis=-1, keepdims=True)
            pv = jnp.dot(p.astype(jnp.bfloat16), v[:, hs],
                         preferred_element_type=jnp.float32)           # (TQ, dh)
            acc_sc[:, hs] = alpha * acc_sc[:, hs] + pv
            m_sc[:, h:h + 1] = m_new

    # Fully-below-diagonal tiles: no iota/compare/select in the hot loop.
    @pl.when(jnp.logical_and(contributes, jnp.logical_not(needs_mask)))
    def _unmasked():
        accumulate(apply_mask=False)

    # Diagonal-crossing tiles: apply the causal mask.
    @pl.when(jnp.logical_and(contributes, needs_mask))
    def _masked():
        accumulate(apply_mask=True)

    @pl.when(ki == pl.num_programs(2) - 1)
    def _finalize():
        for h in range(nheads):
            hs = slice(h * dh, (h + 1) * dh)
            acc_sc[:, hs] = acc_sc[:, hs] * pl.reciprocal(
                l_sc[:, h:h + 1], approx=True)
        out = jnp.dot(acc_sc[...].astype(jnp.bfloat16), wo_ref[...],
                      preferred_element_type=jnp.float32) + bo_ref[...]
        o_ref[...] = out.astype(o_ref.dtype)        # lane-dense (TQ, D) store


# ---------------------------------------------------------------------------
# Wrapper helpers
# ---------------------------------------------------------------------------
def prepare_params(params):
    """One-time weight prep (hoisted out of the per-call path):
    transpose to (in, out), fuse QKV, cast matmul operands to bf16."""
    wqkv = jnp.concatenate([params["wq"].T, params["wk"].T, params["wv"].T],
                           axis=1).astype(jnp.bfloat16)            # (D, 3D)
    bqkv = jnp.concatenate([params["bq"], params["bk"], params["bv"]]
                           ).reshape(1, -1).astype(jnp.float32)    # (1, 3D)
    wo = params["wo"].T.astype(jnp.bfloat16)                       # (D, D)
    bo = params["bo"].reshape(1, -1).astype(jnp.float32)           # (1, D)
    return {"wqkv": wqkv, "bqkv": bqkv, "wo": wo, "bo": bo}


def _mxu_tile_target():
    """256-wide tiles on 256x256-MXU parts (v6e/v7x), 128 otherwise."""
    try:
        kind = jax.devices()[0].device_kind.lower()
    except Exception:
        return 128
    return 128 if any(t in kind for t in ("v2", "v3", "v4", "v5")) else 256


def _pick_tile(s, target):
    if s <= target:
        return s
    for t in range(target, 7, -8):  # largest divisor of s, multiple of 8
        if s % t == 0:
            return t
    return s  # TODO(synk): pad ragged / prime sequence lengths instead


def _vmem_limit(nbytes):
    try:
        cap = int(pltpu.get_tpu_info().vmem_capacity_bytes)
    except Exception:
        cap = 64 << 20                      # conservative (v7x-sized) fallback
    return int(min(max(nbytes + (4 << 20), 16 << 20), cap - (8 << 20)))


def _weight_spec(block_shape, index_map, single_buffer):
    # Constant-index weights/biases are fetched once; double-buffering them only
    # wastes VMEM (a (D,D) bf16 W_o at D=4096 is 32 MiB -> 64 MiB doubled).
    if single_buffer:
        try:
            return pl.BlockSpec(block_shape, index_map,
                                pipeline_mode=pl.Buffered(buffer_count=1))
        except Exception:
            pass
    return pl.BlockSpec(block_shape, index_map)


def block_forward(x, prepared, *, nheads, adaLN_C=0.5, adaLN_eps=1e-6,
                  single_buffer_weights=True):
    B, S, D = x.shape
    assert D % nheads == 0, "dim must be divisible by nheads"
    dh = D // nheads

    wqkv, bqkv = prepared["wqkv"], prepared["bqkv"]
    wo, bo = prepared["wo"], prepared["bo"]
    target = _mxu_tile_target()
    wbuf = 1 if single_buffer_weights else 2

    # ---------------- kernel 1: AdaLN + fused QKV projection ----------------
    ts = _pick_tile(S, target)
    k1_kernel = functools.partial(_qkv_proj_kernel, dim=D,
                                  q_scale=1.0 / math.sqrt(dh),
                                  adaLN_C=adaLN_C, adaLN_eps=adaLN_eps)
    k1_vmem = (2 * ts * D * x.dtype.itemsize          # x blocks (double buffered)
               + wbuf * (D * 3 * D * 2 + 3 * D * 4)   # fused wqkv (bf16) + bqkv
               + 3 * 2 * ts * D * 2                   # q/k/v out blocks (bf16)
               + 4 * ts * D * 4)                      # f32 y / qkv temporaries
    q, k, v = pl.pallas_call(
        k1_kernel,
        out_shape=[jax.ShapeDtypeStruct((B, S, D), jnp.bfloat16)] * 3,
        grid=(B, S // ts),
        in_specs=[
            pl.BlockSpec((None, ts, D), lambda b, s: (b, s, 0)),
            _weight_spec((D, 3 * D), lambda b, s: (0, 0), single_buffer_weights),
            _weight_spec((1, 3 * D), lambda b, s: (0, 0), single_buffer_weights),
        ],
        out_specs=[pl.BlockSpec((None, ts, D), lambda b, s: (b, s, 0))] * 3,
        compiler_params=pltpu.CompilerParams(
            dimension_semantics=("parallel", "parallel"),
            vmem_limit_bytes=_vmem_limit(k1_vmem)),
    )(x, wqkv, bqkv)

    # ------------- kernel 2: flash attention + output projection ------------
    tq = _pick_tile(S, target)
    tk = tq   # equal, aligned tiles => every contributing row has >=1 valid key
    k2_kernel = functools.partial(_flash_attn_out_kernel, nheads=nheads, dh=dh,
                                  tq=tq, tk=tk)

    def kv_map(b, qi, ki):
        # Clamp to the last causally useful kv block: masked upper-triangle grid
        # steps revisit the previous block and the pipeline dedups the DMA.
        return (b, jnp.minimum(ki, (qi * tq + tq - 1) // tk), 0)

    k2_vmem = (2 * tq * D * 2 + 2 * 2 * tk * D * 2    # q + k/v blocks (bf16)
               + wbuf * (D * D * 2 + D * 4)           # wo (bf16), bo
               + 2 * tq * D * x.dtype.itemsize        # out blocks
               + tq * (D + 2 * nheads) * 4            # acc/m/l scratch
               + 8 * tq * tk * 4)                     # live softmax temporaries
    out = pl.pallas_call(
        k2_kernel,
        out_shape=jax.ShapeDtypeStruct((B, S, D), x.dtype),
        grid=(B, S // tq, S // tk),   # ki must stay the innermost axis
        in_specs=[
            pl.BlockSpec((None, tq, D), lambda b, qi, ki: (b, qi, 0)),
            pl.BlockSpec((None, tk, D), kv_map),
            pl.BlockSpec((None, tk, D), kv_map),
            _weight_spec((D, D), lambda b, qi, ki: (0, 0), single_buffer_weights),
            _weight_spec((1, D), lambda b, qi, ki: (0, 0), single_buffer_weights),
        ],
        out_specs=pl.BlockSpec((None, tq, D), lambda b, qi, ki: (b, qi, 0)),
        scratch_shapes=[
            pltpu.VMEM((tq, nheads), jnp.float32),   # running max per head
            pltpu.VMEM((tq, nheads), jnp.float32),   # running sum per head
            pltpu.VMEM((tq, D), jnp.float32),        # output accumulator
        ],
        compiler_params=pltpu.CompilerParams(
            dimension_semantics=("parallel", "parallel", "arbitrary"),
            vmem_limit_bytes=_vmem_limit(k2_vmem)),
    )(q, k, v, wo, bo)
    return out


# ---------------------------------------------------------------------------
# Pure-JAX f32 reference of the same forward pass
# ---------------------------------------------------------------------------
def block_reference(x, params, *, nheads, adaLN_C=0.5, adaLN_eps=1e-6):
    B, S, D = x.shape
    dh = D // nheads
    rms = jnp.sqrt(jnp.mean(x * x, axis=-1, keepdims=True))
    y = x + adaLN_C * x / (rms + adaLN_eps)

    def proj(w, b):
        return jnp.einsum("bsd,ed->bse", y, w) + b

    q = proj(params["wq"], params["bq"]).reshape(B, S, nheads, dh).transpose(0, 2, 1, 3)
    k = proj(params["wk"], params["bk"]).reshape(B, S, nheads, dh).transpose(0, 2, 1, 3)
    v = proj(params["wv"], params["bv"]).reshape(B, S, nheads, dh).transpose(0, 2, 1, 3)

    s = jnp.einsum("bhqd,bhkd->bhqk", q, k) / math.sqrt(dh)
    mask = jnp.tril(jnp.ones((S, S), dtype=bool))
    s = jnp.where(mask, s, -jnp.inf)
    p = jax.nn.softmax(s, axis=-1)
    o = jnp.einsum("bhqk,bhkd->bhqd", p, v).transpose(0, 2, 1, 3).reshape(B, S, D)
    return jnp.einsum("bsd,ed->bse", o, params["wo"]) + params["bo"]


def init_params(key, dim):
    ks = jax.random.split(key, 8)
    scale = 1.0 / math.sqrt(dim)
    p = {}
    for i, name in enumerate(["wq", "wk", "wv", "wo"]):
        p[name] = jax.random.uniform(ks[i], (dim, dim), jnp.float32,
                                     minval=-scale, maxval=scale)
    for i, name in enumerate(["bq", "bk", "bv", "bo"]):
        p[name] = jax.random.uniform(ks[4 + i], (dim,), jnp.float32,
                                     minval=-scale, maxval=scale)
    return p


if __name__ == "__main__":
    B, S, D, H = 2, 8, 32, 4
    key = jax.random.PRNGKey(0)
    kx, kp = jax.random.split(key)
    x = jax.random.normal(kx, (B, S, D), jnp.float32)
    params = init_params(kp, D)
    prepared = prepare_params(params)   # weight prep hoisted out of the call path

    try:
        out = jax.block_until_ready(block_forward(x, prepared, nheads=H))
    except Exception:
        # Fallback if pipeline_mode=pl.Buffered(1) on the weight BlockSpecs is
        # not supported by this jax/backend build: use default double buffering.
        out = jax.block_until_ready(
            block_forward(x, prepared, nheads=H, single_buffer_weights=False))

    ref = block_reference(x, params, nheads=H)
    assert out.shape == (B, S, D)
    # bf16 matmul operands (f32 accumulate) -> loosened tolerance vs f32 ref.
    assert jnp.allclose(out, ref, atol=3e-2, rtol=3e-2), "mismatch vs reference"
    print("KERNEL_OK")
</pallas_src>

<mosaic_0001>
module attributes {stable_mosaic.version = 11 : i64} {
  func.func @_qkv_proj_kernel(%arg0: i32, %arg1: i32, %arg2: memref<1x8x32xf32, #tpu.memory_space<vmem>>, %arg3: memref<32x96xbf16, #tpu.memory_space<vmem>>, %arg4: memref<1x96xf32, #tpu.memory_space<vmem>>, %arg5: memref<1x8x32xbf16, #tpu.memory_space<vmem>>, %arg6: memref<1x8x32xbf16, #tpu.memory_space<vmem>>, %arg7: memref<1x8x32xbf16, #tpu.memory_space<vmem>>) attributes {dimension_semantics = [#tpu.dimension_semantics<parallel>, #tpu.dimension_semantics<parallel>], iteration_bounds = array<i64: 2, 1>, scalar_prefetch = 0 : i64, scratch_operands = 0 : i64, tpu.core_type = #tpu.core_type<tc>, window_params = [{transform_indices = @transform_0, window_bounds = array<i64: 1, 8, 32>}, {pipeline_mode = #tpu.pipeline_mode<synchronous>, transform_indices = @transform_1, window_bounds = array<i64: 32, 96>}, {pipeline_mode = #tpu.pipeline_mode<synchronous>, transform_indices = @transform_2, window_bounds = array<i64: 1, 96>}, {transform_indices = @transform_3, window_bounds = array<i64: 1, 8, 32>}, {transform_indices = @transform_4, window_bounds = array<i64: 1, 8, 32>}, {transform_indices = @transform_5, window_bounds = array<i64: 1, 8, 32>}]} {
    %c0 = arith.constant 0 : index
    %c0_0 = arith.constant 0 : index
    %c0_1 = arith.constant 0 : index
    %0 = vector.load %arg2[%c0, %c0_0, %c0_1] : memref<1x8x32xf32, #tpu.memory_space<vmem>>, vector<1x8x32xf32>
    %1 = vector.shape_cast %0 : vector<1x8x32xf32> to vector<8x32xf32>
    %2 = arith.mulf %1, %1 : vector<8x32xf32>
    %cst = arith.constant dense<0.000000e+00> : vector<8xf32>
    %3 = vector.multi_reduction <add>, %2, %cst [1] : vector<8x32xf32> to vector<8xf32>
    %4 = vector.shape_cast %3 : vector<8xf32> to vector<8x1xf32>
    %cst_2 = arith.constant 3.200000e+01 : f32
    %5 = vector.broadcast %cst_2 : f32 to vector<8x1xf32>
    %6 = arith.divf %4, %5 : vector<8x1xf32>
    %7 = math.sqrt %6 : vector<8x1xf32>
    %cst_3 = arith.constant 5.000000e-01 : f32
    %8 = vector.broadcast %cst_3 : f32 to vector<8x32xf32>
    %9 = arith.mulf %8, %1 : vector<8x32xf32>
    %cst_4 = arith.constant 9.99999997E-7 : f32
    %10 = vector.broadcast %cst_4 : f32 to vector<8x1xf32>
    %11 = arith.addf %7, %10 : vector<8x1xf32>
    %12 = vector.broadcast %11 : vector<8x1xf32> to vector<8x32xf32>
    %13 = arith.divf %9, %12 : vector<8x32xf32>
    %14 = arith.addf %1, %13 : vector<8x32xf32>
    %15 = arith.truncf %14 : vector<8x32xf32> to vector<8x32xbf16>
    %c0_5 = arith.constant 0 : index
    %c0_6 = arith.constant 0 : index
    %16 = vector.load %arg3[%c0_5, %c0_6] : memref<32x96xbf16, #tpu.memory_space<vmem>>, vector<32x96xbf16>
    %cst_7 = arith.constant dense<0.000000e+00> : vector<8x96xf32>
    %17 = tpu.matmul %15, %16, %cst_7 {dimension_numbers = #tpu.dot_dimension_numbers<[1], [0], [0], [1], [0, 0, 1, 1], [], []>} : vector<8x32xbf16>, vector<32x96xbf16>, vector<8x96xf32> -> vector<8x96xf32>
    %c0_8 = arith.constant 0 : index
    %c0_9 = arith.constant 0 : index
    %18 = vector.load %arg4[%c0_8, %c0_9] : memref<1x96xf32, #tpu.memory_space<vmem>>, vector<1x96xf32>
    %19 = vector.broadcast %18 : vector<1x96xf32> to vector<8x96xf32>
    %20 = arith.addf %17, %19 : vector<8x96xf32>
    %21 = vector.extract_strided_slice %20 {offsets = [0, 0], sizes = [8, 32], strides = [1, 1]} : vector<8x96xf32> to vector<8x32xf32>
    %cst_10 = arith.constant 0.353553385 : f32
    %22 = vector.broadcast %cst_10 : f32 to vector<8x32xf32>
    %23 = arith.mulf %21, %22 : vector<8x32xf32>
    %24 = arith.truncf %23 : vector<8x32xf32> to vector<8x32xbf16>
    %c0_11 = arith.constant 0 : index
    %c0_12 = arith.constant 0 : index
    %c0_13 = arith.constant 0 : index
    %25 = vector.load %arg5[%c0_11, %c0_12, %c0_13] : memref<1x8x32xbf16, #tpu.memory_space<vmem>>, vector<1x8x32xbf16>
    %26 = vector.shape_cast %25 : vector<1x8x32xbf16> to vector<8x32xbf16>
    %27 = vector.shape_cast %24 : vector<8x32xbf16> to vector<1x8x32xbf16>
    tpu.vector_store %arg5[%c0_11, %c0_12, %c0_13], %27 {strides = array<i32>} : memref<1x8x32xbf16, #tpu.memory_space<vmem>>, vector<1x8x32xbf16>,
    %28 = vector.extract_strided_slice %20 {offsets = [0, 32], sizes = [8, 32], strides = [1, 1]} : vector<8x96xf32> to vector<8x32xf32>
    %29 = arith.truncf %28 : vector<8x32xf32> to vector<8x32xbf16>
    %c0_14 = arith.constant 0 : index
    %c0_15 = arith.constant 0 : index
    %c0_16 = arith.constant 0 : index
    %30 = vector.load %arg6[%c0_14, %c0_15, %c0_16] : memref<1x8x32xbf16, #tpu.memory_space<vmem>>, vector<1x8x32xbf16>
    %31 = vector.shape_cast %30 : vector<1x8x32xbf16> to vector<8x32xbf16>
    %32 = vector.shape_cast %29 : vector<8x32xbf16> to vector<1x8x32xbf16>
    tpu.vector_store %arg6[%c0_14, %c0_15, %c0_16], %32 {strides = array<i32>} : memref<1x8x32xbf16, #tpu.memory_space<vmem>>, vector<1x8x32xbf16>,
    %33 = vector.extract_strided_slice %20 {offsets = [0, 64], sizes = [8, 32], strides = [1, 1]} : vector<8x96xf32> to vector<8x32xf32>
    %34 = arith.truncf %33 : vector<8x32xf32> to vector<8x32xbf16>
    %c0_17 = arith.constant 0 : index
    %c0_18 = arith.constant 0 : index
    %c0_19 = arith.constant 0 : index
    %35 = vector.load %arg7[%c0_17, %c0_18, %c0_19] : memref<1x8x32xbf16, #tpu.memory_space<vmem>>, vector<1x8x32xbf16>
    %36 = vector.shape_cast %35 : vector<1x8x32xbf16> to vector<8x32xbf16>
    %37 = vector.shape_cast %34 : vector<8x32xbf16> to vector<1x8x32xbf16>
    tpu.vector_store %arg7[%c0_17, %c0_18, %c0_19], %37 {strides = array<i32>} : memref<1x8x32xbf16, #tpu.memory_space<vmem>>, vector<1x8x32xbf16>,
    return
  }
  func.func @transform_0(%arg0: i32, %arg1: i32) -> (i32, i32, i32) {
    %c0_i32 = arith.constant 0 : i32
    %c0_i32_0 = arith.constant 0 : i32
    return %arg0, %arg1, %c0_i32 : i32, i32, i32
  }
  func.func @transform_1(%arg0: i32, %arg1: i32) -> (i32, i32) {
    %c0_i32 = arith.constant 0 : i32
    %c0_i32_0 = arith.constant 0 : i32
    %c0_i32_1 = arith.constant 0 : i32
    return %c0_i32, %c0_i32_0 : i32, i32
  }
  func.func @transform_2(%arg0: i32, %arg1: i32) -> (i32, i32) {
    %c0_i32 = arith.constant 0 : i32
    %c0_i32_0 = arith.constant 0 : i32
    %c0_i32_1 = arith.constant 0 : i32
    return %c0_i32, %c0_i32_0 : i32, i32
  }
  func.func @transform_3(%arg0: i32, %arg1: i32) -> (i32, i32, i32) {
    %c0_i32 = arith.constant 0 : i32
    %c0_i32_0 = arith.constant 0 : i32
    return %arg0, %arg1, %c0_i32 : i32, i32, i32
  }
  func.func @transform_4(%arg0: i32, %arg1: i32) -> (i32, i32, i32) {
    %c0_i32 = arith.constant 0 : i32
    %c0_i32_0 = arith.constant 0 : i32
    return %arg0, %arg1, %c0_i32 : i32, i32, i32
  }
  func.func @transform_5(%arg0: i32, %arg1: i32) -> (i32, i32, i32) {
    %c0_i32 = arith.constant 0 : i32
    %c0_i32_0 = arith.constant 0 : i32
    return %arg0, %arg1, %c0_i32 : i32, i32, i32
  }
}

module attributes {stable_mosaic.version = 11 : i64} {
  func.func @_qkv_proj_kernel(%arg0: i32, %arg1: i32, %arg2: memref<1x8x32xf32, #tpu.memory_space<vmem>>, %arg3: memref<32x96xbf16, #tpu.memory_space<vmem>>, %arg4: memref<1x96xf32, #tpu.memory_space<vmem>>, %arg5: memref<1x8x32xbf16, #tpu.memory_space<vmem>>, %arg6: memref<1x8x32xbf16, #tpu.memory_space<vmem>>, %arg7: memref<1x8x32xbf16, #tpu.memory_space<vmem>>) attributes {dimension_semantics = [#tpu.dimension_semantics<parallel>, #tpu.dimension_semantics<parallel>], iteration_bounds = array<i64: 2, 1>, scalar_prefetch = 0 : i64, scratch_operands = 0 : i64, tpu.core_type = #tpu.core_type<tc>, window_params = [{transform_indices = @transform_0, window_bounds = array<i64: 1, 8, 32>}, {pipeline_mode = #tpu.pipeline_mode<synchronous>, transform_indices = @transform_1, window_bounds = array<i64: 32, 96>}, {pipeline_mode = #tpu.pipeline_mode<synchronous>, transform_indices = @transform_2, window_bounds = array<i64: 1, 96>}, {transform_indices = @transform_3, window_bounds = array<i64: 1, 8, 32>}, {transform_indices = @transform_4, window_bounds = array<i64: 1, 8, 32>}, {transform_indices = @transform_5, window_bounds = array<i64: 1, 8, 32>}]} {
    %c0 = arith.constant 0 : index
    %c0_0 = arith.constant 0 : index
    %c0_1 = arith.constant 0 : index
    %0 = vector.load %arg2[%c0, %c0_0, %c0_1] : memref<1x8x32xf32, #tpu.memory_space<vmem>>, vector<1x8x32xf32>
    %1 = vector.shape_cast %0 : vector<1x8x32xf32> to vector<8x32xf32>
    %2 = arith.mulf %1, %1 : vector<8x32xf32>
    %cst = arith.constant dense<0.000000e+00> : vector<8xf32>
    %3 = vector.multi_reduction <add>, %2, %cst [1] : vector<8x32xf32> to vector<8xf32>
    %4 = vector.shape_cast %3 : vector<8xf32> to vector<8x1xf32>
    %cst_2 = arith.constant 3.200000e+01 : f32
    %5 = vector.broadcast %cst_2 : f32 to vector<8x1xf32>
    %6 = arith.divf %4, %5 : vector<8x1xf32>
    %7 = math.sqrt %6 : vector<8x1xf32>
    %cst_3 = arith.constant 5.000000e-01 : f32
    %8 = vector.broadcast %cst_3 : f32 to vector<8x32xf32>
    %9 = arith.mulf %8, %1 : vector<8x32xf32>
    %cst_4 = arith.constant 9.99999997E-7 : f32
    %10 = vector.broadcast %cst_4 : f32 to vector<8x1xf32>
    %11 = arith.addf %7, %10 : vector<8x1xf32>
    %12 = vector.broadcast %11 : vector<8x1xf32> to vector<8x32xf32>
    %13 = arith.divf %9, %12 : vector<8x32xf32>
    %14 = arith.addf %1, %13 : vector<8x32xf32>
    %15 = arith.truncf %14 : vector<8x32xf32> to vector<8x32xbf16>
    %c0_5 = arith.constant 0 : index
    %c0_6 = arith.constant 0 : index
    %16 = vector.load %arg3[%c0_5, %c0_6] : memref<32x96xbf16, #tpu.memory_space<vmem>>, vector<32x96xbf16>
    %cst_7 = arith.constant dense<0.000000e+00> : vector<8x96xf32>
    %17 = tpu.matmul %15, %16, %cst_7 {dimension_numbers = #tpu.dot_dimension_numbers<[1], [0], [0], [1], [0, 0, 1, 1], [], []>} : vector<8x32xbf16>, vector<32x96xbf16>, vector<8x96xf32> -> vector<8x96xf32>
    %c0_8 = arith.constant 0 : index
    %c0_9 = arith.constant 0 : index
    %18 = vector.load %arg4[%c0_8, %c0_9] : memref<1x96xf32, #tpu.memory_space<vmem>>, vector<1x96xf32>
    %19 = vector.broadcast %18 : vector<1x96xf32> to vector<8x96xf32>
    %20 = arith.addf %17, %19 : vector<8x96xf32>
    %21 = vector.extract_strided_slice %20 {offsets = [0, 0], sizes = [8, 32], strides = [1, 1]} : vector<8x96xf32> to vector<8x32xf32>
    %cst_10 = arith.constant 0.353553385 : f32
    %22 = vector.broadcast %cst_10 : f32 to vector<8x32xf32>
    %23 = arith.mulf %21, %22 : vector<8x32xf32>
    %24 = arith.truncf %23 : vector<8x32xf32> to vector<8x32xbf16>
    %c0_11 = arith.constant 0 : index
    %c0_12 = arith.constant 0 : index
    %c0_13 = arith.constant 0 : index
    %25 = vector.load %arg5[%c0_11, %c0_12, %c0_13] : memref<1x8x32xbf16, #tpu.memory_space<vmem>>, vector<1x8x32xbf16>
    %26 = vector.shape_cast %25 : vector<1x8x32xbf16> to vector<8x32xbf16>
    %27 = vector.shape_cast %24 : vector<8x32xbf16> to vector<1x8x32xbf16>
    tpu.vector_store %arg5[%c0_11, %c0_12, %c0_13], %27 {strides = array<i32>} : memref<1x8x32xbf16, #tpu.memory_space<vmem>>, vector<1x8x32xbf16>,
    %28 = vector.extract_strided_slice %20 {offsets = [0, 32], sizes = [8, 32], strides = [1, 1]} : vector<8x96xf32> to vector<8x32xf32>
    %29 = arith.truncf %28 : vector<8x32xf32> to vector<8x32xbf16>
    %c0_14 = arith.constant 0 : index
    %c0_15 = arith.constant 0 : index
    %c0_16 = arith.constant 0 : index
    %30 = vector.load %arg6[%c0_14, %c0_15, %c0_16] : memref<1x8x32xbf16, #tpu.memory_space<vmem>>, vector<1x8x32xbf16>
    %31 = vector.shape_cast %30 : vector<1x8x32xbf16> to vector<8x32xbf16>
    %32 = vector.shape_cast %29 : vector<8x32xbf16> to vector<1x8x32xbf16>
    tpu.vector_store %arg6[%c0_14, %c0_15, %c0_16], %32 {strides = array<i32>} : memref<1x8x32xbf16, #tpu.memory_space<vmem>>, vector<1x8x32xbf16>,
    %33 = vector.extract_strided_slice %20 {offsets = [0, 64], sizes = [8, 32], strides = [1, 1]} : vector<8x96xf32> to vector<8x32xf32>
    %34 = arith.truncf %33 : vector<8x32xf32> to vector<8x32xbf16>
    %c0_17 = arith.constant 0 : index
    %c0_18 = arith.constant 0 : index
    %c0_19 = arith.constant 0 : index
    %35 = vector.load %arg7[%c0_17, %c0_18, %c0_19] : memref<1x8x32xbf16, #tpu.memory_space<vmem>>, vector<1x8x32xbf16>
    %36 = vector.shape_cast %35 : vector<1x8x32xbf16> to vector<8x32xbf16>
    %37 = vector.shape_cast %34 : vector<8x32xbf16> to vector<1x8x32xbf16>
    tpu.vector_store %arg7[%c0_17, %c0_18, %c0_19], %37 {strides = array<i32>} : memref<1x8x32xbf16, #tpu.memory_space<vmem>>, vector<1x8x32xbf16>,
    return
  }
  func.func @transform_0(%arg0: i32, %arg1: i32) -> (i32, i32, i32) {
    %c0_i32 = arith.constant 0 : i32
    %c0_i32_0 = arith.constant 0 : i32
    return %arg0, %arg1, %c0_i32 : i32, i32, i32
  }
  func.func @transform_1(%arg0: i32, %arg1: i32) -> (i32, i32) {
    %c0_i32 = arith.constant 0 : i32
    %c0_i32_0 = arith.constant 0 : i32
    %c0_i32_1 = arith.constant 0 : i32
    return %c0_i32, %c0_i32_0 : i32, i32
  }
  func.func @transform_2(%arg0: i32, %arg1: i32) -> (i32, i32) {
    %c0_i32 = arith.constant 0 : i32
    %c0_i32_0 = arith.constant 0 : i32
    %c0_i32_1 = arith.constant 0 : i32
    return %c0_i32, %c0_i32_0 : i32, i32
  }
  func.func @transform_3(%arg0: i32, %arg1: i32) -> (i32, i32, i32) {
    %c0_i32 = arith.constant 0 : i32
    %c0_i32_0 = arith.constant 0 : i32
    return %arg0, %arg1, %c0_i32 : i32, i32, i32
  }
  func.func @transform_4(%arg0: i32, %arg1: i32) -> (i32, i32, i32) {
    %c0_i32 = arith.constant 0 : i32
    %c0_i32_0 = arith.constant 0 : i32
    return %arg0, %arg1, %c0_i32 : i32, i32, i32
  }
  func.func @transform_5(%arg0: i32, %arg1: i32) -> (i32, i32, i32) {
    %c0_i32 = arith.constant 0 : i32
    %c0_i32_0 = arith.constant 0 : i32
    return %arg0, %arg1, %c0_i32 : i32, i32, i32
  }
}

</mosaic_0001>

<bundles_post_ra>
// kernel: tpu_custom_call.1
= control target key start
LH: loop header
LB: loop body
LE: loop exit
PB: predicated region body
PF: predicated region fallthrough
CT: control target
= control target key end

     0   :  { %s1185_s0 = inlined_call_operand.hbm [shape: f32[2,8,32], index: 0, kind: input, shape index: {}]   ;;  %s1186_s1 = inlined_call_operand.hbm [shape: bf16[32,96], index: 1, kind: input, shape index: {}]   ;;  %s1187_s2 = inlined_call_operand.vmem [shape: f32[1,96], index: 2, kind: input, shape index: {}]   ;;  %s1188_s3 = inlined_call_operand.hbm [shape: bf16[2,8,32], index: 3, kind: output, shape index: {0}]   ;;  %s1189_s4 = inlined_call_operand.hbm [shape: bf16[2,8,32], index: 4, kind: output, shape index: {1}]   ;;  %s1190_s5 = inlined_call_operand.hbm [shape: bf16[2,8,32], index: 5, kind: output, shape index: {2}]  }
   0x1   :  { %1192 = sst [smem:[#allocation15_spill]] %s1185_s0 }
   0x2   :  { %1193 = sst [smem:[#allocation16_spill]] %s1186_s1 }
   0x3   :  { %1194 = sst [smem:[#allocation17_spill]] %s1187_s2 }
   0x4   :  { %11 = vsyncpa [#allocation3], 0 }
   0x5   :  { %13 = vsyncpa [#allocation3 + $0x1], 0 }
   0x6   :  { %14 = vsyncpa [#allocation6], 0 }
   0x7   :  { %15 = vsyncpa [#allocation4], 0 }
   0x8   :  { %17 = vsyncpa [#allocation4 + $0x1], 0 }
   0x9   :  { %18 = vsyncpa [#allocation9], 0 }
   0xa   :  { %20 = vsyncpa [#allocation9 + $0x1], 0  ;;  %s977_s18 = smov 0   ;;  %s979_s19 = smov 0  }
   0xb   :  { %s981_s20 = smov 0   ;;  %s983_s21 = smov 0  }
   0xc   :  { %s985_s22 = smov 0   ;;  %s987_s23 = smov 0  }
   0xd LB: > { %s1008_s24 = sadd.s32 4294967295, %s939_s23   ;;  %p608_p0 = scmp.ge.s32.totalorder %s939_s23, 1  ;;  %s939_s23 = sphi %s987_s23, %s26_s23   ;;  %s935_s22 = sphi %s985_s22, %s1208_s22   ;;  %s931_s21 = sphi %s983_s21, %s1207_s21   ;;  %s927_s20 = sphi %s981_s20, %s1206_s20   ;;  %s923_s19 = sphi %s979_s19, %s1205_s19   ;;  %s919_s18 = sphi %s977_s18, %s1204_s18  }
   0xe   : > { %p61_p1 = scmp.eq.s32.totalorder %s1008_s24, 0  ;;  %p197_p2 = scmp.lt.s32.totalorder %s939_s23, 3 }
   0xf   : > { %s1195_s1 = sld [smem:[#allocation16_spill]]  ;;  %s941_s29 = smov [#allocation5]  }
  0x10   : > { %p1016_p3 = pnand %p608_p0, %p197_p2  ;;  %s210_s30 = sshll.u32 %s941_s29, 4  ;;  %s211_s30 = int_to_ptr.vmem [resolvable:$true] %s210_s30 }
  0x11   : > { %p610_p6 = scmp.ge.s32.totalorder %s939_s23, 2  ;;  %s942_s6 = smov 64  }
  0x12   : > { %p650_p4 = pneg %p1016_p3  ;;  %s943_s7 = smov 4  }
  0x13   : > { %s1191_s8 = sadd.s32 4294967294, %s939_s23   ;;  %s38_s9 = sadd.s32 1, %s935_s22 }
  0x14   : > { %p651_p5 = pnand %p650_p4, %p61_p1  ;;  %s47_s10 = sadd.s32 1, %s927_s20 }
  0x15   : > { %s208_s27 = sshll.u32 %s1195_s1, 4  ;;  %p40_p7 = scmp.ge.s32.totalorder %s38_s9, 2  ;;  %s209_s27 = int_to_ptr.hbm [resolvable:$true] %s208_s27 }
  0x16   : > { %653 = dma.hbm_to_vmem [thread:$0]  (!%p651_p5), %s209_s27, 256, %s211_s30, [#allocation6], %s942_s6, %s942_s6, %s943_s7  }
  0x17   : > { %p54_p8 = scmp.ne.s32.totalorder %s927_s20, %s923_s19  ;;  %p55_p9 = scmp.eq.s32.totalorder %s939_s23, 0 }
  0x18   : > { %p60_p10 = scmp.ne.s32.totalorder %s923_s19, %s919_s18  ;;  %s1210_s9 = smov (%p40_p7, %s38_s9), 0 }
  0x19   : > { %p1035_p11 = por %p55_p9, %p54_p8  ;;  %s42_s13 = ssub.s32 %s935_s22, %s1210_s9 }
  0x1a   : > { %p1041_p12 = por %p61_p1, %p60_p10  ;;  %p128_p13 = scmp.eq.s32.totalorder %s1008_s24, 1 }
  0x1b   : > { %p45_p0 = scmp.eq.s32.totalorder %s42_s13, 0  ;;  %p134_p2 = scmp.eq.s32.totalorder %s1191_s8, 1 }
  0x1c   : > { %p1050_p4 = por %p128_p13, %p54_p8  ;;  %p669_p5 = scmp.lt.s32.totalorder %s939_s23, 2 }
  0x1d   : > { %s1056_s15 = scalar_select %p45_p0, %s927_s20, %s47_s10  }
  0x1e   : > { %p1058_p7 = por %p134_p2, %p60_p10  ;;  %s227_s17 = sand.u32 1, %s927_s20  }
  0x1f   : > { %s611_s25 = sshll.u32 %s227_s17, 3  ;;  %s612_s26 = sshll.u32 %s935_s22, 3 }
  0x20   : > { %s1201_s0 = sld [smem:[#allocation15_spill]]  ;;  %s231_s6 = scalar_lea.vmem [#allocation2], %s611_s25 }
  0x21   : > { %s240_s7 = sshll.u32 %s231_s6, 4  ;;  %p655_p8 = pnand %p669_p5, %p1035_p11  ;;  %s241_s7 = int_to_ptr.vmem [resolvable:$true] %s240_s7 }
  0x22   : > { %s228_s10 = scalar_lea.sflag [#allocation3], %s227_s17  ;;  %s1072_s8 = sand.u32 (!%p1016_p3), 1, %s923_s19  }
  0x23   : > { %s614_s27 = sshll.u32 (!%p1016_p3), %s1072_s8, 3 }
  0x24   : > { %249 = sbr.rel (%p1016_p3) target bundleno = 473 (0x1d9), region = 32  ;;  %s255_s25 = scalar_lea.vmem (!%p1016_p3), [#allocation2], %s614_s27 }
  0x26   : > { %s236_s30 = scalar_lea.hbm %s1201_s0, %s612_s26  ;;  %s252_s26 = scalar_lea.sflag (!%p1016_p3), [#allocation3], %s1072_s8 }
  0x27   : > { %s238_s13 = sshll.u32 %s236_s30, 4  ;;  %s239_s13 = int_to_ptr.hbm [resolvable:$true] %s238_s13 }
  0x28   : > { %657 = dma.hbm_to_vmem [thread:$0]  (!%p655_p8), %s239_s13, 128, %s241_s7, %s228_s10  }
  0x29   : > { %902 = dma.done.wait (%p1041_p12), %s252_s26, 128  }
  0x2a   : > { %904 = vsyncadd (%p1041_p12), %s252_s26, 4294967168 }
  0x2b   : > { %906 = dma.done.wait (%p61_p1), [#allocation6], 256  }
  0x2c   : > { %908 = vsyncadd (%p61_p1), [#allocation6], 4294967040  ;;  %v299_v0 = vld [vmem:[%s255_s25] sm:$0xff]  ;;  %vm301_vm0 = vcmask 261120   ;;  %v944_v3 = vmov 32.0   ;;  %v637_v8 = vld [vmem:[#allocation5 + $0x8] sm:$0xff] }
  0x2d   : > { %v300_v1 = vmul.f32 %v299_v0, %v299_v0  ;;  %727 = vrcp.f32 %v944_v3  ;;  %373 = vmatpush.bf16.msra.mxu0 %v637_v8  ;;  %v636_v9 = vld [vmem:[#allocation5] sm:$0xff]  ;;  %v325_v31 = vmul.f32 0.5, %v299_v0  ;;  %s1087_s28 = sshll.u32 %s931_s21, 2  ;;  %s1202_s2 = sld [smem:[#allocation17_spill]]  ;;  %vm382_vm8 = vcmask 257024  }
  0x2e   : > { %s1093_s17 = sshll.u32 %s1072_s8, 2  ;;  %s416_s6 = scalar_lea.hbm %s1188_s3, %s1087_s28 }
  0x2f   : > { %v302_v2 = vsel %vm301_vm0, %v300_v1, 0.0  ;;  %s283_s7 = scalar_lea.vmem [#allocation7], %s1093_s17  ;;  %s420_s21 = sshll.u32 %s416_s6, 4  ;;  %s421_s21 = int_to_ptr.hbm [resolvable:$true] %s420_s21 }
  0x30   : > { %303 = vadd.xlane.f32.xlu0 %v302_v2  ;;  %s1100_s13 = sshll.u32 %s283_s7, 4  ;;  %s945_s10 = smov 64   ;;  %s419_s13 = int_to_ptr.vmem [resolvable:$true] %s1100_s13 }
  0x31   : > { %374 = vmatpush.bf16.msra.mxu0 %v636_v9  ;;  %s946_s27 = smov 96   ;;  %s395_s26 = scalar_lea.sflag [#allocation4], %s1072_s8 }
  0x32   : > { %s807_s25 = sshra.s32 %s421_s21, 4  ;;  %s813_s30 = scalar_lea.hbm %s1188_s3, 8  ;;  %s808_s25 = int_to_ptr.hbm [resolvable:$true] %s807_s25 }
  0x33   : > { %v728_v4 = vpop.eup %727  ;;  %v726_v39 = vld [vmem:[%s1202_s2] ss:$0 sm:$0xff]  ;;  %s809_s11 = scalar_lea.hbm %s808_s25, 4  ;;  %p814_p10 = scmp.lt.s32.totalorder %s808_s25, %s1188_s3 }
  0x34   : > { %v306_v5 = vmul.f32 32.0, %v728_v4  ;;  %vm310_vm1 = vweird.f32 %v728_v4  ;;  %p810_p1 = scmp.ne.s32.totalorder %s808_s25, %s809_s11  ;;  %p815_p11 = scmp.lt.s32.totalorder %s813_s30, %s809_s11 }
  0x36   : > { %v307_v6 = vsub.f32 1.0, %v306_v5  ;;  %p811_p3 = pnand %p810_p1, %p1050_p4  ;;  %p816_p12 = por %p815_p11, %p814_p10 }
  0x38   : > { %v308_v7 = vmul.f32 %v728_v4, %v307_v6  ;;  %p812_p9 = pneg %p811_p3 }
  0x3a   : > { %v309_v10 = vadd.f32 %v728_v4, %v308_v7  ;;  %p817_p13 = pnand %p816_p12, %p812_p9 }
  0x3c   : > { %v311_v11 = vsel %vm310_vm1, %v728_v4, %v309_v10 }
  0xa3   : > { %v304_v12 = vpop.xlane.xlu0 %303 }
  0xa4   : > { %v312_v13 = vmul.f32 %v311_v11, %v304_v12 }
  0xa6   : > { %729 = vrsqrt.f32 %v312_v13  ;;  %vm320_vm2 = vcmp.eq.f32.partialorder %v312_v13, inf  ;;  %v323_v21 = vand.u32 2147483648, %v312_v13  ;;  %vm322_vm3 = vcmp.eq.f32.partialorder %v312_v13, 0.0 }
  0xac   : > { %v730_v14 = vpop.eup %729 }
  0xad   : > { %v314_v15 = vmul.f32 %v730_v14, %v312_v13 }
  0xaf   : > { %v315_v16 = vmul.f32 %v730_v14, %v314_v15 }
  0xb1   : > { %v316_v17 = vmul.f32 0.5, %v315_v16 }
  0xb3   : > { %v317_v18 = vsub.f32 1.5, %v316_v17 }
  0xb5   : > { %v318_v19 = vmul.f32 %v730_v14, %v317_v18 }
  0xb7   : > { %v319_v20 = vmul.f32 %v318_v19, %v312_v13 }
  0xb9   : > { %v321_v22 = vsel %vm320_vm2, %v312_v13, %v319_v20 }
  0xba   : > { %v324_v23 = vsel %vm322_vm3, %v323_v21, %v321_v22 }
  0xbb   : > { %v326_v24 = vadd.f32 1e-06, %v324_v23 }
  0xbd   : > { %731 = vrcp.f32 %v326_v24  ;;  %v338_v28 = vand.u32 2147483648, %v326_v24  ;;  %v336_v30 = vand.u32 2147483647, %v326_v24  ;;  %vm332_vm5 = vweird.f32 %v326_v24 }
  0xbf   : > { %v339_v33 = vor.u32 1.1754944e-38, %v338_v28  ;;  %vm337_vm7 = vcmp.eq.f32.partialorder %v336_v30, 8.507059e+37 }
  0xc3   : > { %v732_v25 = vpop.eup %731 }
  0xc4   : > { %v328_v26 = vmul.f32 %v732_v25, %v326_v24  ;;  %vm333_vm4 = vweird.f32 %v732_v25 }
  0xc5   : > { %vm334_vm6 = vmor %vm332_vm5, %vm333_vm4 }
  0xc6   : > { %v329_v27 = vsub.f32 1.0, %v328_v26 }
  0xc8   : > { %v330_v29 = vmul.f32 %v732_v25, %v329_v27 }
  0xca   : > { %v331_v32 = vadd.f32 %v732_v25, %v330_v29 }
  0xcc   : > { %v335_v34 = vsel %vm334_vm6, %v732_v25, %v331_v32 }
  0xcd   : > { %v340_v35 = vsel %vm337_vm7, %v339_v33, %v335_v34 }
  0xce   : > { %v341_v36 = vmul.f32 %v340_v35, %v325_v31 }
  0xd0   : > { %v342_v37 = vadd.f32 %v341_v36, %v299_v0 }
  0xd2   : > { %v343_v38 = vpack.c.bf16 %v342_v37, %v342_v37 }
  0xd4   : > { %627 = vmatmul.msk.bf16.vlgmr.msra.gmra.mxu0 %vm301_vm0, %v343_v38 }
 0x151   : > { %v376_v40 = vpop.f32.mrf.mxu0 }
 0x152   : > { %v377_v41 = vadd.f32 %v726_v39, %v376_v40 }
 0x154   : > { %v380_v42 = vmul.f32 0.35355338, %v377_v41  ;;  %v384_v43 = vpack.c.bf16 %v377_v41, %v377_v41 }
 0x156   : > { %v381_v44 = vpack.c.bf16 %v380_v42, %v380_v42  ;;  %390 = vrot.lane.b32.xlu1 %v384_v43, %s945_s10  ;;  %386 = vrot.lane.b32.xlu0 %v384_v43, %s946_s27 }
 0x158   : > { %383 = vst.msk [vmem:[%s283_s7] sm:$0xf] %vm382_vm8, %v381_v44 }
 0x159   : > { %v378_v45 = vpop.f32.mrf.mxu0 }
 0x15a   : > { %820 = shalt.err (!%p817_p13)
}
 0x15b   : > { %644 = dma.vmem_to_hbm [thread:$0]  (%p1050_p4), %s419_s13, 64, %s421_s21, %s395_s26  }
 0x15c   : > { %s431_s27 = scalar_lea.hbm %s1189_s4, %s1087_s28  ;;  %s446_s25 = scalar_lea.hbm %s1190_s5, %s1087_s28 }
 0x15d   : > { %s399_s11 = sand.u32 1, %s1008_s24   ;;  %s290_s30 = scalar_lea.vmem [#allocation8], %s1093_s17 }
 0x15e   : > { %s433_s6 = sshll.u32 %s290_s30, 4  ;;  %s435_s10 = sshll.u32 %s431_s27, 4  ;;  %s434_s6 = int_to_ptr.vmem [resolvable:$true] %s433_s6  ;;  %s436_s10 = int_to_ptr.hbm [resolvable:$true] %s435_s10 }
 0x15f   : > { %s297_s0 = scalar_lea.vmem [#allocation10], %s1093_s17  ;;  %s1128_s2 = sshll.u32 %s446_s25, 4  ;;  %s451_s2 = int_to_ptr.hbm [resolvable:$true] %s1128_s2 }
 0x160   : > { %s1126_s1 = sshll.u32 %s297_s0, 4  ;;  %s400_s24 = scalar_lea.sflag [#allocation9], %s399_s11  ;;  %s449_s1 = int_to_ptr.vmem [resolvable:$true] %s1126_s1 }
 0x161   : > { %s835_s28 = sshra.s32 %s436_s10, 4  ;;  %s841_s26 = scalar_lea.hbm %s1189_s4, 8  ;;  %s836_s28 = int_to_ptr.hbm [resolvable:$true] %s835_s28 }
 0x162   : > { %s837_s17 = scalar_lea.hbm %s836_s28, 4  ;;  %p842_p8 = scmp.lt.s32.totalorder %s836_s28, %s1189_s4 }
 0x163   : > { %p838_p0 = scmp.ne.s32.totalorder %s836_s28, %s837_s17  ;;  %p843_p1 = scmp.lt.s32.totalorder %s841_s26, %s837_s17 }
 0x165   : > { %p839_p2 = pnand %p838_p0, %p1050_p4  ;;  %p844_p3 = por %p843_p1, %p842_p8 }
 0x167   : > { %p840_p5 = pneg %p839_p2 }
 0x169   : > { %p845_p9 = pnand %p844_p3, %p840_p5 }
 0x1c8   : > { %v391_v46 = vpop.permute.xlu1 %390  ;;  %v387_v47 = vpop.permute.xlu0 %386 }
 0x1c9   : > { %393 = vst.msk [vmem:[%s297_s0] sm:$0xf] %vm382_vm8, %v391_v46 }
 0x1ca   : > { %389 = vst.msk [vmem:[%s290_s30] sm:$0xf] %vm382_vm8, %v387_v47 }
 0x1cb   : > { %848 = shalt.err (!%p845_p9)
}
 0x1cc   : > { %645 = dma.vmem_to_hbm [thread:$0]  (%p1050_p4), %s434_s6, 64, %s436_s10, %s400_s24  }
 0x1cd   : > { %s863_s0 = sshra.s32 %s451_s2, 4  ;;  %s869_s25 = scalar_lea.hbm %s1190_s5, 8  ;;  %s864_s0 = int_to_ptr.hbm [resolvable:$true] %s863_s0 }
 0x1ce   : > { %s865_s27 = scalar_lea.hbm %s864_s0, 4  ;;  %p870_p13 = scmp.lt.s32.totalorder %s864_s0, %s1190_s5 }
 0x1cf   : > { %p866_p10 = scmp.ne.s32.totalorder %s864_s0, %s865_s27  ;;  %p871_p0 = scmp.lt.s32.totalorder %s869_s25, %s865_s27 }
 0x1d1   : > { %p867_p11 = pnand %p866_p10, %p1050_p4  ;;  %p872_p2 = por %p871_p0, %p870_p13 }
 0x1d3   : > { %p868_p12 = pneg %p867_p11 }
 0x1d5   : > { %p873_p5 = pnand %p872_p2, %p868_p12 }
 0x1d7   : > { %876 = shalt.err (!%p873_p5)
}
 0x1d8   : > { %646 = dma.vmem_to_hbm [thread:$0]  (%p1050_p4), %s449_s1, 64, %s451_s2, %s400_s24  }
 0x1d9 PF: > { %s462_s6 = sand.u32 1, %s919_s18   ;;  %p659_p8 = pnand %p610_p6, %p1058_p7 }
 0x1da   : > { %s463_s10 = scalar_lea.sflag [#allocation4], %s462_s6 }
 0x1db   : > { %p660_p1 = pneg %p659_p8 }
 0x1dd   : > { %910 = dma.done.wait (%p660_p1), %s463_s10, 64  }
 0x1de   : > { %912 = vsyncadd (%p660_p1), %s463_s10, 4294967232  ;;  %s1203_s28 = sadd.s32 4294967294, %s939_s23  }
 0x1df   : > { %s472_s14 = sand.u32 1, %s1203_s28  }
 0x1e0   : > { %s473_s17 = scalar_lea.sflag [#allocation9], %s472_s14 }
 0x1e1   : > { %914 = dma.done.wait (%p660_p1), %s473_s17, 128  }
 0x1e2   : > { %916 = vsyncadd (%p660_p1), %s473_s17, 4294967168  ;;  %s26_s23 = sadd.s32 1, %s939_s23   ;;  %s1204_s18 = smov %s923_s19 }
 0x1e3   : > { %p23_p4 = scmp.ge.s32.totalorder %s26_s23, 4   ;;  %s1205_s19 = smov %s927_s20 }
 0x1e4   : > { %s1206_s20 = smov %s1056_s15  ;;  %s1207_s21 = smov %s935_s22 }
 0x1e5   : > { %s1208_s22 = smov %s1210_s9  ;;  %25 = sbr.rel (!%p23_p4) target bundleno = 13 (0xd), region = 113 }
 0x1ea   :  { %489 = vsyncpa [#allocation3], 1 }
 0x1eb   :  { %491 = vsyncpa [#allocation3 + $0x1], 1 }
 0x1ec   :  { %492 = vsyncpa [#allocation6], 1 }
 0x1ed   :  { %493 = vsyncpa [#allocation4], 1 }
 0x1ee   :  { %495 = vsyncpa [#allocation4 + $0x1], 1 }
 0x1ef   :  { %496 = vsyncpa [#allocation9], 1 }
 0x1f0   :  { %498 = vsyncpa [#allocation9 + $0x1], 1 }

// kernel: tpu_custom_call.1
= control target key start
LH: loop header
LB: loop body
LE: loop exit
PB: predicated region body
PF: predicated region fallthrough
CT: control target
= control target key end

     0   :  { %s1185_s0 = inlined_call_operand.hbm [shape: f32[2,8,32], index: 0, kind: input, shape index: {}]   ;;  %s1186_s1 = inlined_call_operand.hbm [shape: bf16[32,96], index: 1, kind: input, shape index: {}]   ;;  %s1187_s2 = inlined_call_operand.vmem [shape: f32[1,96], index: 2, kind: input, shape index: {}]   ;;  %s1188_s3 = inlined_call_operand.hbm [shape: bf16[2,8,32], index: 3, kind: output, shape index: {0}]   ;;  %s1189_s4 = inlined_call_operand.hbm [shape: bf16[2,8,32], index: 4, kind: output, shape index: {1}]   ;;  %s1190_s5 = inlined_call_operand.hbm [shape: bf16[2,8,32], index: 5, kind: output, shape index: {2}]  }
   0x1   :  { %1192 = sst [smem:[#allocation15_spill]] %s1185_s0 }
   0x2   :  { %1193 = sst [smem:[#allocation16_spill]] %s1186_s1 }
   0x3   :  { %1194 = sst [smem:[#allocation17_spill]] %s1187_s2 }
   0x4   :  { %11 = vsyncpa [#allocation3], 0 }
   0x5   :  { %13 = vsyncpa [#allocation3 + $0x1], 0 }
   0x6   :  { %14 = vsyncpa [#allocation6], 0 }
   0x7   :  { %15 = vsyncpa [#allocation4], 0 }
   0x8   :  { %17 = vsyncpa [#allocation4 + $0x1], 0 }
   0x9   :  { %18 = vsyncpa [#allocation9], 0 }
   0xa   :  { %20 = vsyncpa [#allocation9 + $0x1], 0  ;;  %s977_s18 = smov 0   ;;  %s979_s19 = smov 0  }
   0xb   :  { %s981_s20 = smov 0   ;;  %s983_s21 = smov 0  }
   0xc   :  { %s985_s22 = smov 0   ;;  %s987_s23 = smov 0  }
   0xd LB: > { %s1008_s24 = sadd.s32 4294967295, %s939_s23   ;;  %p608_p0 = scmp.ge.s32.totalorder %s939_s23, 1  ;;  %s939_s23 = sphi %s987_s23, %s26_s23   ;;  %s935_s22 = sphi %s985_s22, %s1208_s22   ;;  %s931_s21 = sphi %s983_s21, %s1207_s21   ;;  %s927_s20 = sphi %s981_s20, %s1206_s20   ;;  %s923_s19 = sphi %s979_s19, %s1205_s19   ;;  %s919_s18 = sphi %s977_s18, %s1204_s18  }
   0xe   : > { %p61_p1 = scmp.eq.s32.totalorder %s1008_s24, 0  ;;  %p197_p2 = scmp.lt.s32.totalorder %s939_s23, 3 }
   0xf   : > { %s1195_s1 = sld [smem:[#allocation16_spill]]  ;;  %s941_s29 = smov [#allocation5]  }
  0x10   : > { %p1016_p3 = pnand %p608_p0, %p197_p2  ;;  %s210_s30 = sshll.u32 %s941_s29, 4  ;;  %s211_s30 = int_to_ptr.vmem [resolvable:$true] %s210_s30 }
  0x11   : > { %p610_p6 = scmp.ge.s32.totalorder %s939_s23, 2  ;;  %s942_s6 = smov 64  }
  0x12   : > { %p650_p4 = pneg %p1016_p3  ;;  %s943_s7 = smov 4  }
  0x13   : > { %s1191_s8 = sadd.s32 4294967294, %s939_s23   ;;  %s38_s9 = sadd.s32 1, %s935_s22 }
  0x14   : > { %p651_p5 = pnand %p650_p4, %p61_p1  ;;  %s47_s10 = sadd.s32 1, %s927_s20 }
  0x15   : > { %s208_s27 = sshll.u32 %s1195_s1, 4  ;;  %p40_p7 = scmp.ge.s32.totalorder %s38_s9, 2  ;;  %s209_s27 = int_to_ptr.hbm [resolvable:$true] %s208_s27 }
  0x16   : > { %653 = dma.hbm_to_vmem [thread:$0]  (!%p651_p5), %s209_s27, 256, %s211_s30, [#allocation6], %s942_s6, %s942_s6, %s943_s7  }
  0x17   : > { %p54_p8 = scmp.ne.s32.totalorder %s927_s20, %s923_s19  ;;  %p55_p9 = scmp.eq.s32.totalorder %s939_s23, 0 }
  0x18   : > { %p60_p10 = scmp.ne.s32.totalorder %s923_s19, %s919_s18  ;;  %s1210_s9 = smov (%p40_p7, %s38_s9), 0 }
  0x19   : > { %p1035_p11 = por %p55_p9, %p54_p8  ;;  %s42_s13 = ssub.s32 %s935_s22, %s1210_s9 }
  0x1a   : > { %p1041_p12 = por %p61_p1, %p60_p10  ;;  %p128_p13 = scmp.eq.s32.totalorder %s1008_s24, 1 }
  0x1b   : > { %p45_p0 = scmp.eq.s32.totalorder %s42_s13, 0  ;;  %p134_p2 = scmp.eq.s32.totalorder %s1191_s8, 1 }
  0x1c   : > { %p1050_p4 = por %p128_p13, %p54_p8  ;;  %p669_p5 = scmp.lt.s32.totalorder %s939_s23, 2 }
  0x1d   : > { %s1056_s15 = scalar_select %p45_p0, %s927_s20, %s47_s10  }
  0x1e   : > { %p1058_p7 = por %p134_p2, %p60_p10  ;;  %s227_s17 = sand.u32 1, %s927_s20  }
  0x1f   : > { %s611_s25 = sshll.u32 %s227_s17, 3  ;;  %s612_s26 = sshll.u32 %s935_s22, 3 }
  0x20   : > { %s1201_s0 = sld [smem:[#allocation15_spill]]  ;;  %s231_s6 = scalar_lea.vmem [#allocation2], %s611_s25 }
  0x21   : > { %s240_s7 = sshll.u32 %s231_s6, 4  ;;  %p655_p8 = pnand %p669_p5, %p1035_p11  ;;  %s241_s7 = int_to_ptr.vmem [resolvable:$true] %s240_s7 }
  0x22   : > { %s228_s10 = scalar_lea.sflag [#allocation3], %s227_s17  ;;  %s1072_s8 = sand.u32 (!%p1016_p3), 1, %s923_s19  }
  0x23   : > { %s614_s27 = sshll.u32 (!%p1016_p3), %s1072_s8, 3 }
  0x24   : > { %249 = sbr.rel (%p1016_p3) target bundleno = 473 (0x1d9), region = 32  ;;  %s255_s25 = scalar_lea.vmem (!%p1016_p3), [#allocation2], %s614_s27 }
  0x26   : > { %s236_s30 = scalar_lea.hbm %s1201_s0, %s612_s26  ;;  %s252_s26 = scalar_lea.sflag (!%p1016_p3), [#allocation3], %s1072_s8 }
  0x27   : > { %s238_s13 = sshll.u32 %s236_s30, 4  ;;  %s239_s13 = int_to_ptr.hbm [resolvable:$true] %s238_s13 }
  0x28   : > { %657 = dma.hbm_to_vmem [thread:$0]  (!%p655_p8), %s239_s13, 128, %s241_s7, %s228_s10  }
  0x29   : > { %902 = dma.done.wait (%p1041_p12), %s252_s26, 128  }
  0x2a   : > { %904 = vsyncadd (%p1041_p12), %s252_s26, 4294967168 }
  0x2b   : > { %906 = dma.done.wait (%p61_p1), [#allocation6], 256  }
  0x2c   : > { %908 = vsyncadd (%p61_p1), [#allocation6], 4294967040  ;;  %v299_v0 = vld [vmem:[%s255_s25] sm:$0xff]  ;;  %vm301_vm0 = vcmask 261120   ;;  %v944_v3 = vmov 32.0   ;;  %v637_v8 = vld [vmem:[#allocation5 + $0x8] sm:$0xff] }
  0x2d   : > { %v300_v1 = vmul.f32 %v299_v0, %v299_v0  ;;  %727 = vrcp.f32 %v944_v3  ;;  %373 = vmatpush.bf16.msra.mxu0 %v637_v8  ;;  %v636_v9 = vld [vmem:[#allocation5] sm:$0xff]  ;;  %v325_v31 = vmul.f32 0.5, %v299_v0  ;;  %s1087_s28 = sshll.u32 %s931_s21, 2  ;;  %s1202_s2 = sld [smem:[#allocation17_spill]]  ;;  %vm382_vm8 = vcmask 257024  }
  0x2e   : > { %s1093_s17 = sshll.u32 %s1072_s8, 2  ;;  %s416_s6 = scalar_lea.hbm %s1188_s3, %s1087_s28 }
  0x2f   : > { %v302_v2 = vsel %vm301_vm0, %v300_v1, 0.0  ;;  %s283_s7 = scalar_lea.vmem [#allocation7], %s1093_s17  ;;  %s420_s21 = sshll.u32 %s416_s6, 4  ;;  %s421_s21 = int_to_ptr.hbm [resolvable:$true] %s420_s21 }
  0x30   : > { %303 = vadd.xlane.f32.xlu0 %v302_v2  ;;  %s1100_s13 = sshll.u32 %s283_s7, 4  ;;  %s945_s10 = smov 64   ;;  %s419_s13 = int_to_ptr.vmem [resolvable:$true] %s1100_s13 }
  0x31   : > { %374 = vmatpush.bf16.msra.mxu0 %v636_v9  ;;  %s946_s27 = smov 96   ;;  %s395_s26 = scalar_lea.sflag [#allocation4], %s1072_s8 }
  0x32   : > { %s807_s25 = sshra.s32 %s421_s21, 4  ;;  %s813_s30 = scalar_lea.hbm %s1188_s3, 8  ;;  %s808_s25 = int_to_ptr.hbm [resolvable:$true] %s807_s25 }
  0x33   : > { %v728_v4 = vpop.eup %727  ;;  %v726_v39 = vld [vmem:[%s1202_s2] ss:$0 sm:$0xff]  ;;  %s809_s11 = scalar_lea.hbm %s808_s25, 4  ;;  %p814_p10 = scmp.lt.s32.totalorder %s808_s25, %s1188_s3 }
  0x34   : > { %v306_v5 = vmul.f32 32.0, %v728_v4  ;;  %vm310_vm1 = vweird.f32 %v728_v4  ;;  %p810_p1 = scmp.ne.s32.totalorder %s808_s25, %s809_s11  ;;  %p815_p11 = scmp.lt.s32.totalorder %s813_s30, %s809_s11 }
  0x36   : > { %v307_v6 = vsub.f32 1.0, %v306_v5  ;;  %p811_p3 = pnand %p810_p1, %p1050_p4  ;;  %p816_p12 = por %p815_p11, %p814_p10 }
  0x38   : > { %v308_v7 = vmul.f32 %v728_v4, %v307_v6  ;;  %p812_p9 = pneg %p811_p3 }
  0x3a   : > { %v309_v10 = vadd.f32 %v728_v4, %v308_v7  ;;  %p817_p13 = pnand %p816_p12, %p812_p9 }
  0x3c   : > { %v311_v11 = vsel %vm310_vm1, %v728_v4, %v309_v10 }
  0xa3   : > { %v304_v12 = vpop.xlane.xlu0 %303 }
  0xa4   : > { %v312_v13 = vmul.f32 %v311_v11, %v304_v12 }
  0xa6   : > { %729 = vrsqrt.f32 %v312_v13  ;;  %vm320_vm2 = vcmp.eq.f32.partialorder %v312_v13, inf  ;;  %v323_v21 = vand.u32 2147483648, %v312_v13  ;;  %vm322_vm3 = vcmp.eq.f32.partialorder %v312_v13, 0.0 }
  0xac   : > { %v730_v14 = vpop.eup %729 }
  0xad   : > { %v314_v15 = vmul.f32 %v730_v14, %v312_v13 }
  0xaf   : > { %v315_v16 = vmul.f32 %v730_v14, %v314_v15 }
  0xb1   : > { %v316_v17 = vmul.f32 0.5, %v315_v16 }
  0xb3   : > { %v317_v18 = vsub.f32 1.5, %v316_v17 }
  0xb5   : > { %v318_v19 = vmul.f32 %v730_v14, %v317_v18 }
  0xb7   : > { %v319_v20 = vmul.f32 %v318_v19, %v312_v13 }
  0xb9   : > { %v321_v22 = vsel %vm320_vm2, %v312_v13, %v319_v20 }
  0xba   : > { %v324_v23 = vsel %vm322_vm3, %v323_v21, %v321_v22 }
  0xbb   : > { %v326_v24 = vadd.f32 1e-06, %v324_v23 }
  0xbd   : > { %731 = vrcp.f32 %v326_v24  ;;  %v338_v28 = vand.u32 2147483648, %v326_v24  ;;  %v336_v30 = vand.u32 2147483647, %v326_v24  ;;  %vm332_vm5 = vweird.f32 %v326_v24 }
  0xbf   : > { %v339_v33 = vor.u32 1.1754944e-38, %v338_v28  ;;  %vm337_vm7 = vcmp.eq.f32.partialorder %v336_v30, 8.507059e+37 }
  0xc3   : > { %v732_v25 = vpop.eup %731 }
  0xc4   : > { %v328_v26 = vmul.f32 %v732_v25, %v326_v24  ;;  %vm333_vm4 = vweird.f32 %v732_v25 }
  0xc5   : > { %vm334_vm6 = vmor %vm332_vm5, %vm333_vm4 }
  0xc6   : > { %v329_v27 = vsub.f32 1.0, %v328_v26 }
  0xc8   : > { %v330_v29 = vmul.f32 %v732_v25, %v329_v27 }
  0xca   : > { %v331_v32 = vadd.f32 %v732_v25, %v330_v29 }
  0xcc   : > { %v335_v34 = vsel %vm334_vm6, %v732_v25, %v331_v32 }
  0xcd   : > { %v340_v35 = vsel %vm337_vm7, %v339_v33, %v335_v34 }
  0xce   : > { %v341_v36 = vmul.f32 %v340_v35, %v325_v31 }
  0xd0   : > { %v342_v37 = vadd.f32 %v341_v36, %v299_v0 }
  0xd2   : > { %v343_v38 = vpack.c.bf16 %v342_v37, %v342_v37 }
  0xd4   : > { %627 = vmatmul.msk.bf16.vlgmr.msra.gmra.mxu0 %vm301_vm0, %v343_v38 }
 0x151   : > { %v376_v40 = vpop.f32.mrf.mxu0 }
 0x152   : > { %v377_v41 = vadd.f32 %v726_v39, %v376_v40 }
 0x154   : > { %v380_v42 = vmul.f32 0.35355338, %v377_v41  ;;  %v384_v43 = vpack.c.bf16 %v377_v41, %v377_v41 }
 0x156   : > { %v381_v44 = vpack.c.bf16 %v380_v42, %v380_v42  ;;  %390 = vrot.lane.b32.xlu1 %v384_v43, %s945_s10  ;;  %386 = vrot.lane.b32.xlu0 %v384_v43, %s946_s27 }
 0x158   : > { %383 = vst.msk [vmem:[%s283_s7] sm:$0xf] %vm382_vm8, %v381_v44 }
 0x159   : > { %v378_v45 = vpop.f32.mrf.mxu0 }
 0x15a   : > { %820 = shalt.err (!%p817_p13)
}
 0x15b   : > { %644 = dma.vmem_to_hbm [thread:$0]  (%p1050_p4), %s419_s13, 64, %s421_s21, %s395_s26  }
 0x15c   : > { %s431_s27 = scalar_lea.hbm %s1189_s4, %s1087_s28  ;;  %s446_s25 = scalar_lea.hbm %s1190_s5, %s1087_s28 }
 0x15d   : > { %s399_s11 = sand.u32 1, %s1008_s24   ;;  %s290_s30 = scalar_lea.vmem [#allocation8], %s1093_s17 }
 0x15e   : > { %s433_s6 = sshll.u32 %s290_s30, 4  ;;  %s435_s10 = sshll.u32 %s431_s27, 4  ;;  %s434_s6 = int_to_ptr.vmem [resolvable:$true] %s433_s6  ;;  %s436_s10 = int_to_ptr.hbm [resolvable:$true] %s435_s10 }
 0x15f   : > { %s297_s0 = scalar_lea.vmem [#allocation10], %s1093_s17  ;;  %s1128_s2 = sshll.u32 %s446_s25, 4  ;;  %s451_s2 = int_to_ptr.hbm [resolvable:$true] %s1128_s2 }
 0x160   : > { %s1126_s1 = sshll.u32 %s297_s0, 4  ;;  %s400_s24 = scalar_lea.sflag [#allocation9], %s399_s11  ;;  %s449_s1 = int_to_ptr.vmem [resolvable:$true] %s1126_s1 }
 0x161   : > { %s835_s28 = sshra.s32 %s436_s10, 4  ;;  %s841_s26 = scalar_lea.hbm %s1189_s4, 8  ;;  %s836_s28 = int_to_ptr.hbm [resolvable:$true] %s835_s28 }
 0x162   : > { %s837_s17 = scalar_lea.hbm %s836_s28, 4  ;;  %p842_p8 = scmp.lt.s32.totalorder %s836_s28, %s1189_s4 }
 0x163   : > { %p838_p0 = scmp.ne.s32.totalorder %s836_s28, %s837_s17  ;;  %p843_p1 = scmp.lt.s32.totalorder %s841_s26, %s837_s17 }
 0x165   : > { %p839_p2 = pnand %p838_p0, %p1050_p4  ;;  %p844_p3 = por %p843_p1, %p842_p8 }
 0x167   : > { %p840_p5 = pneg %p839_p2 }
 0x169   : > { %p845_p9 = pnand %p844_p3, %p840_p5 }
 0x1c8   : > { %v391_v46 = vpop.permute.xlu1 %390  ;;  %v387_v47 = vpop.permute.xlu0 %386 }
 0x1c9   : > { %393 = vst.msk [vmem:[%s297_s0] sm:$0xf] %vm382_vm8, %v391_v46 }
 0x1ca   : > { %389 = vst.msk [vmem:[%s290_s30] sm:$0xf] %vm382_vm8, %v387_v47 }
 0x1cb   : > { %848 = shalt.err (!%p845_p9)
}
 0x1cc   : > { %645 = dma.vmem_to_hbm [thread:$0]  (%p1050_p4), %s434_s6, 64, %s436_s10, %s400_s24  }
 0x1cd   : > { %s863_s0 = sshra.s32 %s451_s2, 4  ;;  %s869_s25 = scalar_lea.hbm %s1190_s5, 8  ;;  %s864_s0 = int_to_ptr.hbm [resolvable:$true] %s863_s0 }
 0x1ce   : > { %s865_s27 = scalar_lea.hbm %s864_s0, 4  ;;  %p870_p13 = scmp.lt.s32.totalorder %s864_s0, %s1190_s5 }
 0x1cf   : > { %p866_p10 = scmp.ne.s32.totalorder %s864_s0, %s865_s27  ;;  %p871_p0 = scmp.lt.s32.totalorder %s869_s25, %s865_s27 }
 0x1d1   : > { %p867_p11 = pnand %p866_p10, %p1050_p4  ;;  %p872_p2 = por %p871_p0, %p870_p13 }
 0x1d3   : > { %p868_p12 = pneg %p867_p11 }
 0x1d5   : > { %p873_p5 = pnand %p872_p2, %p868_p12 }
 0x1d7   : > { %876 = shalt.err (!%p873_p5)
}
 0x1d8   : > { %646 = dma.vmem_to_hbm [thread:$0]  (%p1050_p4), %s449_s1, 64, %s451_s2, %s400_s24  }
 0x1d9 PF: > { %s462_s6 = sand.u32 1, %s919_s18   ;;  %p659_p8 = pnand %p610_p6, %p1058_p7 }
 0x1da   : > { %s463_s10 = scalar_lea.sflag [#allocation4], %s462_s6 }
 0x1db   : > { %p660_p1 = pneg %p659_p8 }
 0x1dd   : > { %910 = dma.done.wait (%p660_p1), %s463_s10, 64  }
 0x1de   : > { %912 = vsyncadd (%p660_p1), %s463_s10, 4294967232  ;;  %s1203_s28 = sadd.s32 4294967294, %s939_s23  }
 0x1df   : > { %s472_s14 = sand.u32 1, %s1203_s28  }
 0x1e0   : > { %s473_s17 = scalar_lea.sflag [#allocation9], %s472_s14 }
 0x1e1   : > { %914 = dma.done.wait (%p660_p1), %s473_s17, 128  }
 0x1e2   : > { %916 = vsyncadd (%p660_p1), %s473_s17, 4294967168  ;;  %s26_s23 = sadd.s32 1, %s939_s23   ;;  %s1204_s18 = smov %s923_s19 }
 0x1e3   : > { %p23_p4 = scmp.ge.s32.totalorder %s26_s23, 4   ;;  %s1205_s19 = smov %s927_s20 }
 0x1e4   : > { %s1206_s20 = smov %s1056_s15  ;;  %s1207_s21 = smov %s935_s22 }
 0x1e5   : > { %s1208_s22 = smov %s1210_s9  ;;  %25 = sbr.rel (!%p23_p4) target bundleno = 13 (0xd), region = 113 }
 0x1ea   :  { %489 = vsyncpa [#allocation3], 1 }
 0x1eb   :  { %491 = vsyncpa [#allocation3 + $0x1], 1 }
 0x1ec   :  { %492 = vsyncpa [#allocation6], 1 }
 0x1ed   :  { %493 = vsyncpa [#allocation4], 1 }
 0x1ee   :  { %495 = vsyncpa [#allocation4 + $0x1], 1 }
 0x1ef   :  { %496 = vsyncpa [#allocation9], 1 }
 0x1f0   :  { %498 = vsyncpa [#allocation9 + $0x1], 1 }

</bundles_post_ra>
